<compile_context>
chip_gen: v6e
topology: v6e:2x2x1
jax: 0.10.0
libtpu: 0.0.40
codegen_flags: <defaults>
</compile_context>

<pallas_src>
import functools

import jax
import jax.numpy as jnp
from jax.experimental import pallas as pl
from jax.experimental.pallas import tpu as pltpu


# ---------------------------------------------------------------------------
# Kernel 1: conv-stem matmul -> SiLU -> per-exam pooled-sum accumulator.
# Grid = (B, NP // TNP); pooled output block is resident across the NP-tile axis.
# ---------------------------------------------------------------------------
def _stem_pool_kernel(patches_ref, wconv_ref, bconv_ref, pooled_ref, *, inv_np):
    t = pl.program_id(1)

    @pl.when(t == 0)
    def _():
        pooled_ref[...] = jnp.zeros_like(pooled_ref)

    # bf16 patches x bf16 weights -> f32 accumulate on the MXU.
    feats = jnp.dot(patches_ref[...], wconv_ref[...],
                    preferred_element_type=jnp.float32)          # (TNP, NC) f32
    feats = feats + bconv_ref[...]
    feats = feats * jax.nn.sigmoid(feats)                        # SiLU (f32, v5e-safe)

    # Accumulate the per-exam sum; mean applied at the last tile.
    pooled_ref[...] += jnp.sum(feats, axis=0, keepdims=True)[None]   # (1, 1, NC)

    @pl.when(t == pl.num_programs(1) - 1)
    def _():
        pooled_ref[...] = pooled_ref[...] * inv_np


# ---------------------------------------------------------------------------
# Kernel 2: MLP head.  Linear(NC,512)(bf16 MXU) -> ReLU -> Dropout(eval: id)
#            -> Linear(512,1) as VPU multiply + lane reduction.
# ---------------------------------------------------------------------------
def _head_kernel(pooled_ref, w1_ref, b1_ref, w2_ref, b2_ref, out_ref):
    pooled = pooled_ref[...].astype(jnp.bfloat16)                # (B, NC)
    h = jnp.dot(pooled, w1_ref[...],
                preferred_element_type=jnp.float32) + b1_ref[...]  # (B, HID) f32
    h = jnp.maximum(h, 0.0)
    # N=1 output: VPU multiply + lane reduce instead of a masked MXU pass.
    y = jnp.sum(h * w2_ref[...], axis=-1, keepdims=True) + b2_ref[...]
    out_ref[...] = y                                             # (B, 1)


# ---------------------------------------------------------------------------
# Wrapper helpers
# ---------------------------------------------------------------------------
def _round_up(v, m):
    return ((v + m - 1) // m) * m


def _pick_tile(np_total, cap=128):
    """Largest multiple-of-8 divisor of np_total that is <= cap (fallback: full)."""
    for cand in range(min(cap, np_total), 0, -1):
        if np_total % cand == 0 and cand % 8 == 0:
            return cand
    return np_total


def _im2col_3x3_s2_bf16(x, kp):
    """x: (B, n, C, H, W) NCHW f32 -> patches (B, n*OH*OW, KP) bf16 (pad=1, stride=2).

    The bf16 cast and the K -> KP zero-pad are folded into the same construction
    pass so XLA emits a single fused gather/pack instead of pad+cast round trips.
    """
    B, n, C, H, W = x.shape
    OH, OW = H // 2, W // 2
    xb = x.reshape(B * n, C, H, W).transpose(0, 2, 3, 1).astype(jnp.bfloat16)  # NHWC
    xp = jnp.pad(xb, ((0, 0), (1, 1), (1, 1), (0, 0)))
    cols = []
    for kh in range(3):
        for kw in range(3):
            cols.append(xp[:, kh:kh + 2 * OH:2, kw:kw + 2 * OW:2, :])
    patches = jnp.stack(cols, axis=3).reshape(B * n, OH, OW, 9 * C)
    patches = jnp.pad(patches, ((0, 0), (0, 0), (0, 0), (0, kp - 9 * C)))
    return patches.reshape(B, n * OH * OW, kp)


def prepare_params(wconv, bconv, w1, b1, w2, b2):
    """Pad/cast the (per-call constant) weights ONCE, outside the jitted forward."""
    K, NC = wconv.shape
    KP = _round_up(K, 8)                                         # 27 -> 32
    wconv_p = jnp.pad(wconv, ((0, KP - K), (0, 0))).astype(jnp.bfloat16)
    return (wconv_p,
            bconv.reshape(1, NC).astype(jnp.float32),
            w1.astype(jnp.bfloat16),
            b1.reshape(1, -1).astype(jnp.float32),
            w2.reshape(1, -1).astype(jnp.float32),               # (1, HID) row
            b2.reshape(1, 1).astype(jnp.float32))


@jax.jit
def model_iafoss_forward(x, wconv_p, bconv, w1, b1, w2row, b2):
    B = x.shape[0]
    KP, NC = wconv_p.shape
    HID = w1.shape[1]

    patches = _im2col_3x3_s2_bf16(x, KP)                         # (B, NP, KP) bf16
    NP = patches.shape[1]
    TNP = _pick_tile(NP, cap=128)
    nt = NP // TNP
    inv_np = 1.0 / NP

    # --- stem matmul + SiLU + per-exam mean pool, tiled over (B, NP-tiles) ---
    pooled = pl.pallas_call(
        functools.partial(_stem_pool_kernel, inv_np=inv_np),
        out_shape=jax.ShapeDtypeStruct((B, 1, NC), jnp.float32),   # lane-dense pooled
        grid=(B, nt),
        in_specs=[
            pl.BlockSpec((pl.Squeezed(), TNP, KP), lambda b, t: (b, t, 0)),
            pl.BlockSpec((KP, NC), lambda b, t: (0, 0)),
            pl.BlockSpec((1, NC), lambda b, t: (0, 0)),
        ],
        out_specs=pl.BlockSpec((1, 1, NC), lambda b, t: (b, 0, 0)),
        compiler_params=pltpu.CompilerParams(
            dimension_semantics=("parallel", "arbitrary"),
            vmem_limit_bytes=32 * 1024 * 1024),
    )(patches, wconv_p, bconv)
    pooled = pooled.reshape(B, NC)

    # --- tiny MLP head in its own micro-kernel -------------------------------
    y = pl.pallas_call(
        _head_kernel,
        out_shape=jax.ShapeDtypeStruct((B, 1), jnp.float32),
        grid=(1,),
        in_specs=[
            pl.BlockSpec((B, NC), lambda i: (0, 0)),
            pl.BlockSpec((NC, HID), lambda i: (0, 0)),
            pl.BlockSpec((1, HID), lambda i: (0, 0)),
            pl.BlockSpec((1, HID), lambda i: (0, 0)),
            pl.BlockSpec((1, 1), lambda i: (0, 0)),
        ],
        out_specs=pl.BlockSpec((B, 1), lambda i: (0, 0)),
    )(pooled, w1, b1, w2row, b2)
    return y


# ---------------------------------------------------------------------------
# Pure-JAX f32 reference of the same forward (for correctness check).
# ---------------------------------------------------------------------------
def _reference(x, wconv, bconv, w1, b1, w2, b2):
    B, n, C, H, W = x.shape
    OH, OW = H // 2, W // 2
    xb = x.reshape(B * n, C, H, W).transpose(0, 2, 3, 1)
    xp = jnp.pad(xb, ((0, 0), (1, 1), (1, 1), (0, 0)))
    cols = [xp[:, kh:kh + 2 * OH:2, kw:kw + 2 * OW:2, :]
            for kh in range(3) for kw in range(3)]
    patches = jnp.stack(cols, axis=3).reshape(B, n * OH * OW, 9 * C)
    feats = patches @ wconv + bconv[None, None, :]
    feats = feats * jax.nn.sigmoid(feats)
    pooled = feats.mean(axis=1)
    h = jnp.maximum(pooled @ w1 + b1[None, :], 0.0)
    return h @ w2 + b2[None, :]


if __name__ == "__main__":
    B, n, C, H, W = 2, 4, 3, 16, 16       # (batch, tiles-per-exam, in_chans=3, H, W)
    NC, HID = 128, 512                    # NC stands in for timm num_features (1280)

    key = jax.random.PRNGKey(0)
    kx, kc, kcb, k1, k2 = jax.random.split(key, 5)
    x = jax.random.normal(kx, (B, n, C, H, W), jnp.float32)

    wconv = 0.1 * jax.random.normal(kc, (3 * 3 * C, NC), jnp.float32)
    bconv = 0.01 * jax.random.normal(kcb, (NC,), jnp.float32)
    w1 = (1.0 / jnp.sqrt(NC)) * jax.random.normal(k1, (NC, HID), jnp.float32)
    b1 = jnp.zeros((HID,), jnp.float32)
    w2 = (1.0 / jnp.sqrt(HID)) * jax.random.normal(k2, (HID, 1), jnp.float32)
    b2 = jnp.zeros((1,), jnp.float32)

    params = prepare_params(wconv, bconv, w1, b1, w2, b2)
    y = model_iafoss_forward(x, *params)
    y = jax.block_until_ready(y)

    # Reference stays in f32; tolerance relaxed for the bf16 MXU operands.
    y_ref = _reference(x, wconv, bconv, w1, b1, w2, b2)
    assert y.shape == (B, 1)
    assert jnp.allclose(y, y_ref, atol=5e-2, rtol=5e-2), (y, y_ref)
    print("KERNEL_OK")
</pallas_src>

<mosaic_0001>
module attributes {stable_mosaic.version = 11 : i64} {
  func.func @_head_kernel(%arg0: i32, %arg1: memref<2x128xf32, #tpu.memory_space<vmem>>, %arg2: memref<128x512xbf16, #tpu.memory_space<vmem>>, %arg3: memref<1x512xf32, #tpu.memory_space<vmem>>, %arg4: memref<1x512xf32, #tpu.memory_space<vmem>>, %arg5: memref<1x1xf32, #tpu.memory_space<vmem>>, %arg6: memref<2x1xf32, #tpu.memory_space<vmem>>) attributes {dimension_semantics = [#tpu.dimension_semantics<arbitrary>], iteration_bounds = array<i64: 1>, scalar_prefetch = 0 : i64, scratch_operands = 0 : i64, tpu.core_type = #tpu.core_type<tc>, window_params = [{pipeline_mode = #tpu.pipeline_mode<synchronous>, transform_indices = @transform_0, window_bounds = array<i64: 2, 128>}, {pipeline_mode = #tpu.pipeline_mode<synchronous>, transform_indices = @transform_1, window_bounds = array<i64: 128, 512>}, {pipeline_mode = #tpu.pipeline_mode<synchronous>, transform_indices = @transform_2, window_bounds = array<i64: 1, 512>}, {pipeline_mode = #tpu.pipeline_mode<synchronous>, transform_indices = @transform_3, window_bounds = array<i64: 1, 512>}, {pipeline_mode = #tpu.pipeline_mode<synchronous>, transform_indices = @transform_4, window_bounds = array<i64: 1, 1>}, {pipeline_mode = #tpu.pipeline_mode<synchronous>, transform_indices = @transform_5, window_bounds = array<i64: 2, 1>}]} {
    %c0 = arith.constant 0 : index
    %c0_0 = arith.constant 0 : index
    %0 = vector.load %arg1[%c0, %c0_0] : memref<2x128xf32, #tpu.memory_space<vmem>>, vector<2x128xf32>
    %1 = arith.truncf %0 : vector<2x128xf32> to vector<2x128xbf16>
    %c0_1 = arith.constant 0 : index
    %c0_2 = arith.constant 0 : index
    %2 = vector.load %arg2[%c0_1, %c0_2] : memref<128x512xbf16, #tpu.memory_space<vmem>>, vector<128x512xbf16>
    %cst = arith.constant dense<0.000000e+00> : vector<2x512xf32>
    %3 = tpu.matmul %1, %2, %cst {dimension_numbers = #tpu.dot_dimension_numbers<[1], [0], [0], [1], [0, 0, 1, 1], [], []>} : vector<2x128xbf16>, vector<128x512xbf16>, vector<2x512xf32> -> vector<2x512xf32>
    %c0_3 = arith.constant 0 : index
    %c0_4 = arith.constant 0 : index
    %4 = vector.load %arg3[%c0_3, %c0_4] : memref<1x512xf32, #tpu.memory_space<vmem>>, vector<1x512xf32>
    %5 = vector.broadcast %4 : vector<1x512xf32> to vector<2x512xf32>
    %6 = arith.addf %3, %5 : vector<2x512xf32>
    %cst_5 = arith.constant 0.000000e+00 : f32
    %7 = vector.broadcast %cst_5 : f32 to vector<2x512xf32>
    %8 = arith.maximumf %6, %7 : vector<2x512xf32>
    %c0_6 = arith.constant 0 : index
    %c0_7 = arith.constant 0 : index
    %9 = vector.load %arg4[%c0_6, %c0_7] : memref<1x512xf32, #tpu.memory_space<vmem>>, vector<1x512xf32>
    %10 = vector.broadcast %9 : vector<1x512xf32> to vector<2x512xf32>
    %11 = arith.mulf %8, %10 : vector<2x512xf32>
    %cst_8 = arith.constant dense<0.000000e+00> : vector<2xf32>
    %12 = vector.multi_reduction <add>, %11, %cst_8 [1] : vector<2x512xf32> to vector<2xf32>
    %13 = vector.shape_cast %12 : vector<2xf32> to vector<2x1xf32>
    %c0_9 = arith.constant 0 : index
    %c0_10 = arith.constant 0 : index
    %14 = vector.load %arg5[%c0_9, %c0_10] : memref<1x1xf32, #tpu.memory_space<vmem>>, vector<1x1xf32>
    %15 = vector.broadcast %14 : vector<1x1xf32> to vector<2x1xf32>
    %16 = arith.addf %13, %15 : vector<2x1xf32>
    %c0_11 = arith.constant 0 : index
    %c0_12 = arith.constant 0 : index
    %17 = vector.load %arg6[%c0_11, %c0_12] : memref<2x1xf32, #tpu.memory_space<vmem>>, vector<2x1xf32>
    tpu.vector_store %arg6[%c0_11, %c0_12], %16 {strides = array<i32>} : memref<2x1xf32, #tpu.memory_space<vmem>>, vector<2x1xf32>,
    return
  }
  func.func @transform_0(%arg0: i32) -> (i32, i32) {
    %c0_i32 = arith.constant 0 : i32
    %c0_i32_0 = arith.constant 0 : i32
    %c0_i32_1 = arith.constant 0 : i32
    return %c0_i32, %c0_i32_0 : i32, i32
  }
  func.func @transform_1(%arg0: i32) -> (i32, i32) {
    %c0_i32 = arith.constant 0 : i32
    %c0_i32_0 = arith.constant 0 : i32
    %c0_i32_1 = arith.constant 0 : i32
    return %c0_i32, %c0_i32_0 : i32, i32
  }
  func.func @transform_2(%arg0: i32) -> (i32, i32) {
    %c0_i32 = arith.constant 0 : i32
    %c0_i32_0 = arith.constant 0 : i32
    %c0_i32_1 = arith.constant 0 : i32
    return %c0_i32, %c0_i32_0 : i32, i32
  }
  func.func @transform_3(%arg0: i32) -> (i32, i32) {
    %c0_i32 = arith.constant 0 : i32
    %c0_i32_0 = arith.constant 0 : i32
    %c0_i32_1 = arith.constant 0 : i32
    return %c0_i32, %c0_i32_0 : i32, i32
  }
  func.func @transform_4(%arg0: i32) -> (i32, i32) {
    %c0_i32 = arith.constant 0 : i32
    %c0_i32_0 = arith.constant 0 : i32
    %c0_i32_1 = arith.constant 0 : i32
    return %c0_i32, %c0_i32_0 : i32, i32
  }
  func.func @transform_5(%arg0: i32) -> (i32, i32) {
    %c0_i32 = arith.constant 0 : i32
    %c0_i32_0 = arith.constant 0 : i32
    %c0_i32_1 = arith.constant 0 : i32
    return %c0_i32, %c0_i32_0 : i32, i32
  }
}

module attributes {stable_mosaic.version = 11 : i64} {
  func.func @_stem_pool_kernel(%arg0: i32, %arg1: i32, %arg2: memref<1x128x32xbf16, #tpu.memory_space<vmem>>, %arg3: memref<32x128xbf16, #tpu.memory_space<vmem>>, %arg4: memref<1x128xf32, #tpu.memory_space<vmem>>, %arg5: memref<1x1x128xf32, #tpu.memory_space<vmem>>) attributes {dimension_semantics = [#tpu.dimension_semantics<parallel>, #tpu.dimension_semantics<arbitrary>], iteration_bounds = array<i64: 2, 2>, scalar_prefetch = 0 : i64, scratch_operands = 0 : i64, tpu.core_type = #tpu.core_type<tc>, window_params = [{transform_indices = @transform_0, window_bounds = array<i64: 1, 128, 32>}, {pipeline_mode = #tpu.pipeline_mode<synchronous>, transform_indices = @transform_1, window_bounds = array<i64: 32, 128>}, {pipeline_mode = #tpu.pipeline_mode<synchronous>, transform_indices = @transform_2, window_bounds = array<i64: 1, 128>}, {transform_indices = @transform_3, window_bounds = array<i64: 1, 1, 128>}]} {
    %c0_i32 = arith.constant 0 : i32
    %0 = arith.cmpi eq, %arg1, %c0_i32 : i32
    %1 = arith.extui %0 : i1 to i32
    %c0_i32_0 = arith.constant 0 : i32
    %2 = arith.cmpi ne, %1, %c0_i32_0 : i32
    scf.if %2 {
      %cst_16 = arith.constant 0.000000e+00 : f32
      %25 = vector.broadcast %cst_16 : f32 to vector<1x1x128xf32>
      %c0_17 = arith.constant 0 : index
      %c0_18 = arith.constant 0 : index
      %c0_19 = arith.constant 0 : index
      %26 = vector.load %arg5[%c0_17, %c0_18, %c0_19] : memref<1x1x128xf32, #tpu.memory_space<vmem>>, vector<1x1x128xf32>
      tpu.vector_store %arg5[%c0_17, %c0_18, %c0_19], %25 {strides = array<i32>} : memref<1x1x128xf32, #tpu.memory_space<vmem>>, vector<1x1x128xf32>,
    } else {
    }
    %c0 = arith.constant 0 : index
    %c0_1 = arith.constant 0 : index
    %c0_2 = arith.constant 0 : index
    %3 = vector.load %arg2[%c0, %c0_1, %c0_2] : memref<1x128x32xbf16, #tpu.memory_space<vmem>>, vector<1x128x32xbf16>
    %4 = vector.shape_cast %3 : vector<1x128x32xbf16> to vector<128x32xbf16>
    %c0_3 = arith.constant 0 : index
    %c0_4 = arith.constant 0 : index
    %5 = vector.load %arg3[%c0_3, %c0_4] : memref<32x128xbf16, #tpu.memory_space<vmem>>, vector<32x128xbf16>
    %cst = arith.constant dense<0.000000e+00> : vector<128x128xf32>
    %6 = tpu.matmul %4, %5, %cst {dimension_numbers = #tpu.dot_dimension_numbers<[1], [0], [0], [1], [0, 0, 1, 1], [], []>} : vector<128x32xbf16>, vector<32x128xbf16>, vector<128x128xf32> -> vector<128x128xf32>
    %c0_5 = arith.constant 0 : index
    %c0_6 = arith.constant 0 : index
    %7 = vector.load %arg4[%c0_5, %c0_6] : memref<1x128xf32, #tpu.memory_space<vmem>>, vector<1x128xf32>
    %8 = vector.broadcast %7 : vector<1x128xf32> to vector<128x128xf32>
    %9 = arith.addf %6, %8 : vector<128x128xf32>
    %10 = arith.negf %9 : vector<128x128xf32>
    %11 = math.exp %10 : vector<128x128xf32>
    %cst_7 = arith.constant 1.000000e+00 : f32
    %12 = vector.broadcast %cst_7 : f32 to vector<128x128xf32>
    %13 = arith.addf %12, %11 : vector<128x128xf32>
    %14 = arith.divf %12, %13 : vector<128x128xf32>
    %15 = arith.mulf %9, %14 : vector<128x128xf32>
    %c0_8 = arith.constant 0 : index
    %c0_9 = arith.constant 0 : index
    %c0_10 = arith.constant 0 : index
    %16 = vector.load %arg5[%c0_8, %c0_9, %c0_10] : memref<1x1x128xf32, #tpu.memory_space<vmem>>, vector<1x1x128xf32>
    %cst_11 = arith.constant dense<0.000000e+00> : vector<128xf32>
    %17 = vector.multi_reduction <add>, %15, %cst_11 [0] : vector<128x128xf32> to vector<128xf32>
    %18 = vector.shape_cast %17 : vector<128xf32> to vector<1x128xf32>
    %19 = vector.shape_cast %18 : vector<1x128xf32> to vector<1x1x128xf32>
    %20 = arith.addf %16, %19 : vector<1x1x128xf32>
    %c0_12 = arith.constant 0 : index
    %c0_13 = arith.constant 0 : index
    %c0_14 = arith.constant 0 : index
    %21 = vector.load %arg5[%c0_12, %c0_13, %c0_14] : memref<1x1x128xf32, #tpu.memory_space<vmem>>, vector<1x1x128xf32>
    tpu.vector_store %arg5[%c0_12, %c0_13, %c0_14], %20 {strides = array<i32>} : memref<1x1x128xf32, #tpu.memory_space<vmem>>, vector<1x1x128xf32>,
    %c1_i32 = arith.constant 1 : i32
    %22 = arith.cmpi eq, %arg1, %c1_i32 : i32
    %23 = arith.extui %22 : i1 to i32
    %c0_i32_15 = arith.constant 0 : i32
    %24 = arith.cmpi ne, %23, %c0_i32_15 : i32
    scf.if %24 {
      %c0_16 = arith.constant 0 : index
      %c0_17 = arith.constant 0 : index
      %c0_18 = arith.constant 0 : index
      %25 = vector.load %arg5[%c0_16, %c0_17, %c0_18] : memref<1x1x128xf32, #tpu.memory_space<vmem>>, vector<1x1x128xf32>
      %cst_19 = arith.constant 3.906250e-03 : f32
      %26 = vector.broadcast %cst_19 : f32 to vector<1x1x128xf32>
      %27 = arith.mulf %25, %26 : vector<1x1x128xf32>
      %c0_20 = arith.constant 0 : index
      %c0_21 = arith.constant 0 : index
      %c0_22 = arith.constant 0 : index
      %28 = vector.load %arg5[%c0_20, %c0_21, %c0_22] : memref<1x1x128xf32, #tpu.memory_space<vmem>>, vector<1x1x128xf32>
      tpu.vector_store %arg5[%c0_20, %c0_21, %c0_22], %27 {strides = array<i32>} : memref<1x1x128xf32, #tpu.memory_space<vmem>>, vector<1x1x128xf32>,
    } else {
    }
    return
  }
  func.func @transform_0(%arg0: i32, %arg1: i32) -> (i32, i32, i32) {
    %c0_i32 = arith.constant 0 : i32
    %c0_i32_0 = arith.constant 0 : i32
    return %arg0, %arg1, %c0_i32 : i32, i32, i32
  }
  func.func @transform_1(%arg0: i32, %arg1: i32) -> (i32, i32) {
    %c0_i32 = arith.constant 0 : i32
    %c0_i32_0 = arith.constant 0 : i32
    %c0_i32_1 = arith.constant 0 : i32
    return %c0_i32, %c0_i32_0 : i32, i32
  }
  func.func @transform_2(%arg0: i32, %arg1: i32) -> (i32, i32) {
    %c0_i32 = arith.constant 0 : i32
    %c0_i32_0 = arith.constant 0 : i32
    %c0_i32_1 = arith.constant 0 : i32
    return %c0_i32, %c0_i32_0 : i32, i32
  }
  func.func @transform_3(%arg0: i32, %arg1: i32) -> (i32, i32, i32) {
    %c0_i32 = arith.constant 0 : i32
    %c0_i32_0 = arith.constant 0 : i32
    %c0_i32_1 = arith.constant 0 : i32
    return %arg0, %c0_i32, %c0_i32_0 : i32, i32, i32
  }
}

</mosaic_0001>

<bundles_post_ra>
// kernel: model_iafoss_forward.3
= control target key start
LH: loop header
LB: loop body
LE: loop exit
PB: predicated region body
PF: predicated region fallthrough
CT: control target
= control target key end

     0   :  { %v457_v1 = vmov 0   ;;  %v59_v36 = vlaneseq  ;;  %vm351_vm0 = vcmask 1041408   ;;  %vm369_vm1 = vcmask 1024   ;;  %s599_s1 = inlined_call_operand.vmem [shape: bf16[128,512], index: 1, kind: input, shape index: {}]   ;;  %s600_s0 = inlined_call_operand.vmem [shape: f32[2,128], index: 0, kind: input, shape index: {}]   ;;  %s601_s4 = inlined_call_operand.<no memory space> [shape: f32[1,1], index: 4, kind: input, shape index: {}]   ;;  %s602_s2 = inlined_call_operand.vmem [shape: f32[1,512], index: 2, kind: input, shape index: {}]   ;;  %s603_s3 = inlined_call_operand.vmem [shape: f32[1,512], index: 3, kind: input, shape index: {}]   ;;  %s604_s5 = inlined_call_operand.vmem [shape: f32[2,1], index: 5, kind: output, shape index: {}]  }
   0x1   :  { %v409_v0 = vld [vmem:[%s599_s1 + $0xe4] ss:$16 sps:$4 sm:$0xff]   ;;  %271 = vmatprep.mubr.bf16.mxu0 %v457_v1  ;;  %312 = vmatprep.mubr.bf16.mxu1 %v457_v1  ;;  %v411_v2 = vld [vmem:[%s599_s1 + $0xec] ss:$16 sps:$4 sm:$0xff]   ;;  %v413_v3 = vld [vmem:[%s599_s1 + $0xe0] ss:$16 sps:$4 sm:$0xff]   ;;  %v10_v35 = vstv %s601_s4 }
   0x2   :  { %239 = vmatprep.subr.bf16.mxu0 %v409_v0  ;;  %v414_v4 = vld [vmem:[%s599_s1 + $0xe8] ss:$16 sps:$4 sm:$0xff]   ;;  %280 = vmatprep.subr.bf16.mxu1 %v411_v2  ;;  %v415_v5 = vld [vmem:[%s599_s1 + $0xc4] ss:$16 sps:$4 sm:$0xff]   ;;  %v417_v6 = vld [vmem:[%s599_s1 + $0xcc] ss:$16 sps:$4 sm:$0xff]  }
   0x3   :  { %240 = vmatpush1.bf16.msra.mxu0 %v413_v3  ;;  %281 = vmatpush1.bf16.msra.mxu1 %v414_v4  ;;  %v419_v7 = vld [vmem:[%s599_s1 + $0xc0] ss:$16 sps:$4 sm:$0xff]   ;;  %v420_v8 = vld [vmem:[%s599_s1 + $0xc8] ss:$16 sps:$4 sm:$0xff]   ;;  %v421_v9 = vld [vmem:[%s599_s1 + $0xa4] ss:$16 sps:$4 sm:$0xff]  }
   0x4   :  { %241 = vmatprep.subr.bf16.mxu0 %v415_v5  ;;  %282 = vmatprep.subr.bf16.mxu1 %v417_v6  ;;  %v423_v10 = vld [vmem:[%s599_s1 + $0xac] ss:$16 sps:$4 sm:$0xff]   ;;  %v425_v11 = vld [vmem:[%s599_s1 + $0xa0] ss:$16 sps:$4 sm:$0xff]   ;;  %v426_v12 = vld [vmem:[%s599_s1 + $0xa8] ss:$16 sps:$4 sm:$0xff]  }
   0x5   :  { %v427_v13 = vld [vmem:[%s599_s1 + $0x84] ss:$16 sps:$4 sm:$0xff]   ;;  %v429_v14 = vld [vmem:[%s599_s1 + $0x8c] ss:$16 sps:$4 sm:$0xff]   ;;  %v431_v15 = vld [vmem:[%s599_s1 + $0x80] ss:$16 sps:$4 sm:$0xff]  }
   0x6   :  { %v432_v16 = vld [vmem:[%s599_s1 + $0x88] ss:$16 sps:$4 sm:$0xff]   ;;  %v433_v17 = vld [vmem:[%s599_s1 + $0x64] ss:$16 sps:$4 sm:$0xff]   ;;  %v435_v18 = vld [vmem:[%s599_s1 + $0x6c] ss:$16 sps:$4 sm:$0xff]  }
   0x7   :  { %242 = vmatpush1.bf16.msra.mxu0 %v419_v7  ;;  %283 = vmatpush1.bf16.msra.mxu1 %v420_v8  ;;  %v437_v19 = vld [vmem:[%s599_s1 + $0x60] ss:$16 sps:$4 sm:$0xff]   ;;  %v438_v20 = vld [vmem:[%s599_s1 + $0x68] ss:$16 sps:$4 sm:$0xff]   ;;  %v439_v21 = vld [vmem:[%s599_s1 + $0x44] ss:$16 sps:$4 sm:$0xff]  }
   0x8   :  { %243 = vmatprep.subr.bf16.mxu0 %v421_v9  ;;  %284 = vmatprep.subr.bf16.mxu1 %v423_v10  ;;  %v441_v22 = vld [vmem:[%s599_s1 + $0x4c] ss:$16 sps:$4 sm:$0xff]   ;;  %v443_v23 = vld [vmem:[%s599_s1 + $0x40] ss:$16 sps:$4 sm:$0xff]   ;;  %v444_v24 = vld [vmem:[%s599_s1 + $0x48] ss:$16 sps:$4 sm:$0xff]  }
   0x9   :  { %v445_v25 = vld [vmem:[%s599_s1 + $0x24] ss:$16 sps:$4 sm:$0xff]   ;;  %v447_v26 = vld [vmem:[%s599_s1 + $0x2c] ss:$16 sps:$4 sm:$0xff]   ;;  %v449_v27 = vld [vmem:[%s599_s1 + $0x20] ss:$16 sps:$4 sm:$0xff]  }
   0xa   :  { %v450_v28 = vld [vmem:[%s599_s1 + $0x28] ss:$16 sps:$4 sm:$0xff]   ;;  %v451_v29 = vld [vmem:[%s599_s1 + $0x4] ss:$16 sps:$4 sm:$0xff]   ;;  %v453_v30 = vld [vmem:[%s599_s1 + $0xc] ss:$16 sps:$4 sm:$0xff]  }
   0xb   :  { %244 = vmatpush1.bf16.msra.mxu0 %v425_v11  ;;  %285 = vmatpush1.bf16.msra.mxu1 %v426_v12  ;;  %v455_v31 = vld [vmem:[%s599_s1] ss:$16 sps:$4 sm:$0xff]   ;;  %v456_v32 = vld [vmem:[%s599_s1 + $0x8] ss:$16 sps:$4 sm:$0xff]   ;;  %11 = vst [vmem:[#allocation2] sm:$0x1] %v10_v35 }
   0xc   :  { %245 = vmatprep.subr.bf16.mxu0 %v427_v13  ;;  %286 = vmatprep.subr.bf16.mxu1 %v429_v14  ;;  %v23_v33 = vld [vmem:[%s600_s0] sm:$0x3]  ;;  %v60_v37 = vshrl.u32 %v59_v36, 7 }
   0xd   :  { %v24_v34 = vpack.c.bf16 %v23_v33, %v23_v33  ;;  %v57_v40 = vld [vmem:[%s602_s2] sm:$0xf] }
   0xe   :  { %v61_v38 = vsub.s32 0, %v60_v37  ;;  %v69_v39 = vsub.s32 2, %v60_v37  ;;  %v65_v41 = vsub.s32 1, %v60_v37  ;;  %v73_v42 = vsub.s32 3, %v60_v37  ;;  %v325_v45 = vld [vmem:[%s603_s3] sm:$0xf] }
   0xf   :  { %246 = vmatpush1.bf16.msra.mxu0 %v431_v15  ;;  %287 = vmatpush1.bf16.msra.mxu1 %v432_v16 }
  0x10   :  { %247 = vmatprep.subr.bf16.mxu0 %v433_v17  ;;  %288 = vmatprep.subr.bf16.mxu1 %v435_v18  ;;  %v62_v43 = vrot.slane %v57_v40, %v61_v38  ;;  %v70_v44 = vrot.slane %v57_v40, %v69_v39  ;;  %v66_v46 = vrot.slane %v57_v40, %v65_v41 }
  0x11   :  { %v74_v47 = vrot.slane %v57_v40, %v73_v42  ;;  %v330_v51 = vrot.slane %v325_v45, %v61_v38  ;;  %v338_v53 = vrot.slane %v325_v45, %v69_v39  ;;  %v334_v55 = vrot.slane %v325_v45, %v65_v41 }
  0x12   :  { %v342_v63 = vrot.slane %v325_v45, %v73_v42  ;;  %v407_v15 = vld [vmem:[#allocation2] ss:$0 sm:$0xff] }
  0x13   :  { %248 = vmatpush1.bf16.msra.mxu0 %v437_v19  ;;  %289 = vmatpush1.bf16.msra.mxu1 %v438_v20 }
  0x14   :  { %249 = vmatprep.subr.bf16.mxu0 %v439_v21  ;;  %290 = vmatprep.subr.bf16.mxu1 %v441_v22 }
  0x17   :  { %250 = vmatpush1.bf16.msra.mxu0 %v443_v23  ;;  %291 = vmatpush1.bf16.msra.mxu1 %v444_v24 }
  0x18   :  { %251 = vmatprep.subr.bf16.mxu0 %v445_v25  ;;  %292 = vmatprep.subr.bf16.mxu1 %v447_v26 }
  0x1b   :  { %252 = vmatpush1.bf16.msra.mxu0 %v449_v27  ;;  %293 = vmatpush1.bf16.msra.mxu1 %v450_v28 }
  0x1c   :  { %253 = vmatprep.subr.bf16.mxu0 %v451_v29  ;;  %294 = vmatprep.subr.bf16.mxu1 %v453_v30 }
  0x1f   :  { %254 = vmatpush1.bf16.msra.mxu0 %v455_v31  ;;  %295 = vmatpush1.bf16.msra.mxu1 %v456_v32 }
  0x22   :  { %272 = vmatmul.mubr.bf16.vlgmr.msra.gmra.mxu0 %v24_v34  ;;  %313 = vmatmul.mubr.bf16.vlgmr.msra.gmra.mxu1 %v24_v34 }
  0xe2   :  { %v273_v48 = vpop.f32.mrf.mxu0  ;;  %v314_v49 = vpop.f32.mrf.mxu1 }
  0xe3   :  { %v274_v50 = vadd.f32 %v273_v48, %v62_v43  ;;  %v315_v52 = vadd.f32 %v314_v49, %v70_v44 }
  0xe4   :  { %v275_v54 = vpop.f32.mrf.mxu0  ;;  %v316_v56 = vpop.f32.mrf.mxu1 }
  0xe5   :  { %v321_v57 = vmax.f32 %v274_v50, 0.0  ;;  %v323_v58 = vmax.f32 %v315_v52, 0.0  ;;  %v276_v59 = vadd.f32 %v275_v54, %v66_v46  ;;  %v317_v60 = vadd.f32 %v316_v56, %v74_v47 }
  0xe6   :  { %v277_v61 = vpop.f32.mrf.mxu0  ;;  %v318_v62 = vpop.f32.mrf.mxu1 }
  0xe7   :  { %v347_v0 = vmul.f32 %v330_v51, %v321_v57  ;;  %v349_v1 = vmul.f32 %v338_v53, %v323_v58  ;;  %v322_v2 = vmax.f32 %v276_v59, 0.0  ;;  %v324_v3 = vmax.f32 %v317_v60, 0.0 }
  0xe8   :  { %v278_v4 = vpop.f32.mrf.mxu0  ;;  %v319_v5 = vpop.f32.mrf.mxu1 }
  0xe9   :  { %v348_v6 = vmul.f32 %v334_v55, %v322_v2  ;;  %v350_v7 = vmul.f32 %v342_v63, %v324_v3  ;;  %v352_v8 = vsel %vm351_vm0, %v347_v0, 0.0  ;;  %v355_v10 = vsel %vm351_vm0, %v349_v1, 0.0 }
  0xeb   :  { %v353_v9 = vsel %vm351_vm0, %v348_v6, 0.0  ;;  %v357_v13 = vsel %vm351_vm0, %v350_v7, 0.0 }
  0xec   :  { %v354_v11 = vadd.f32 %v353_v9, %v352_v8 }
  0xee   :  { %v356_v12 = vadd.f32 %v355_v10, %v354_v11 }
  0xf0   :  { %v358_v14 = vadd.f32 %v357_v13, %v356_v12 }
  0xf2   :  { %359 = vadd.xlane.f32.xlu0 %v358_v14 }
 0x17b   :  { %v360_v16 = vpop.xlane.xlu0 %359 }
 0x17c   :  { %v368_v17 = vadd.f32 %v407_v15, %v360_v16 }
 0x17e   :  { %370 = vst.msk [vmem:[%s604_s5] sm:$0x3] %vm369_vm1, %v368_v17 }

// kernel: model_iafoss_forward.2
= control target key start
LH: loop header
LB: loop body
LE: loop exit
PB: predicated region body
PF: predicated region fallthrough
CT: control target
= control target key end

     0   :  { %s866_s12 = smov 0   ;;  %s868_s13 = smov 0   ;;  %s1028_s0 = inlined_call_operand.vmem [shape: bf16[2,256,32], index: 0, kind: input, shape index: {}]   ;;  %s1029_s1 = inlined_call_operand.vmem [shape: bf16[32,128], index: 1, kind: input, shape index: {}]   ;;  %s1030_s2 = inlined_call_operand.vmem [shape: f32[1,128], index: 2, kind: input, shape index: {}]   ;;  %s1031_s3 = inlined_call_operand.vmem [shape: f32[2,1,128], index: 3, kind: output, shape index: {}]  }
   0x1   :  { %s870_s14 = smov 0   ;;  %s872_s15 = smov 0  }
   0x2   :  { %s874_s16 = smov 0  }
   0x3 LB: > { %s22_s17 = sadd.s32 1, %s835_s14  ;;  %s25_s18 = sadd.s32 1, %s839_s15  ;;  %s843_s16 = sphi %s874_s16, %s13_s16   ;;  %s839_s15 = sphi %s872_s15, %s1035_s15   ;;  %s835_s14 = sphi %s870_s14, %s1034_s14   ;;  %s831_s13 = sphi %s868_s13, %s1033_s13   ;;  %s827_s12 = sphi %s866_s12, %s1032_s12  }
   0x4   : > { %p23_p0 = scmp.ge.s32.totalorder %s22_s17, 2  ;;  %p613_p1 = scmp.ge.s32.totalorder %s843_s16, 1 }
   0x5   : > { %p156_p2 = scmp.lt.s32.totalorder %s843_s16, 5 }
   0x6   : > { %s1037_s17 = smov (%p23_p0, %s22_s17), 0  ;;  %s1039_s18 = smov (!%p23_p0, %s25_s18), %s839_s15 }
   0x7   : > { %p157_p3 = pnand %p613_p1, %p156_p2  ;;  %p27_p4 = scmp.ge.s32.totalorder %s1039_s18, 2 }
   0x8   : > { %s614_s19 = sshll.u32 (!%p157_p3), %s827_s12, 4  ;;  %p183_p5 = scmp.lt.s32.totalorder (!%p157_p3), %s831_s13, 1 }
   0x9   : > { %s1041_s18 = smov (%p27_p4, %s1039_s18), 0  ;;  %160 = sbr.rel (%p157_p3) target bundleno = 322 (0x142), region = 32 }
   0xa   : > { %p185_p6 = scmp.lt.s32.totalorder (!%p157_p3), %s614_s19, 31  ;;  %p617_p7 = scmp.ne.s32.totalorder (!%p157_p3), %s827_s12, 0 }
   0xe   : > { %s1043_s13 = smov (!%p183_p5, %s831_s13), 1  ;;  %s1045_s19 = smov (!%p185_p6, %s614_s19), 31 }
   0xf   : > { %s615_s20 = sshll.u32 %s1043_s13, 5  ;;  %s902_s23 = scalar_lea.vmem %s1031_s3, %s1043_s13 }
  0x10   : > { %s188_s24 = sadd.s32 %s615_s20, %s1045_s19  ;;  %199 = sbr.rel (%p617_p7) target bundleno = 23 (0x17), region = 36 }
  0x11   : > { %s616_s25 = sshll.u32 %s188_s24, 2 }
  0x12   : > { %s190_s28 = scalar_lea.vmem %s1028_s0, %s616_s25 }
  0x15   : > { %v845_v0 = vmov 0.0  }
  0x16   : > { %200 = vst [vmem:[%s902_s23] sm:$0x1] %v845_v0 }
  0x17 PF: > { %v731_v1 = vld [vmem:[%s1029_s1 + $0x8] sm:$0xff]   ;;  %v732_v2 = vld [vmem:[%s1029_s1] sm:$0xff]   ;;  %vm280_vm0 = vcmask 261120   ;;  %v737_v7 = vld [vmem:[%s190_s28 + $0x10] sm:$0xff]   ;;  %p653_p8 = scmp.ne.s32.totalorder %s827_s12, 1 }
  0x18   : > { %666 = vmatprep.subr.bf16.mxu0 %v731_v1  ;;  %686 = vmatprep.subr.bf16.mxu1 %v731_v1  ;;  %v733_v3 = vld [vmem:[%s190_s28] sm:$0xff]   ;;  %v735_v5 = vld [vmem:[%s190_s28 + $0x8] sm:$0xff]   ;;  %v738_v8 = vld [vmem:[%s190_s28 + $0x30] sm:$0xff]  }
  0x19   : > { %667 = vmatpush3.bf16.msra.mxu0 %v731_v1  ;;  %688 = vmatpush3.bf16.msra.mxu1 %v731_v1  ;;  %v734_v4 = vld [vmem:[%s190_s28 + $0x20] sm:$0xff]   ;;  %v736_v6 = vld [vmem:[%s190_s28 + $0x28] sm:$0xff]   ;;  %v739_v9 = vld [vmem:[%s190_s28 + $0x18] sm:$0xff]  }
  0x1a   : > { %668 = vmatprep.subr.bf16.mxu0 %v732_v2  ;;  %687 = vmatprep.subr.bf16.mxu1 %v732_v2  ;;  %v740_v10 = vld [vmem:[%s190_s28 + $0x38] sm:$0xff]   ;;  %v926_v11 = vld [vmem:[%s1030_s2] ss:$0 sm:$0xff] }
  0x1b   : > { %670 = vmatprep.mubr.msk.bf16.mxu0 %vm280_vm0, %v733_v3  ;;  %678 = vmatprep.mubr.msk.bf16.mxu1 %vm280_vm0, %v734_v4 }
  0x1d   : > { %669 = vmatpush3.bf16.msra.mxu0 %v732_v2  ;;  %689 = vmatpush3.bf16.msra.mxu1 %v732_v2 }
  0x20   : > { %671 = vmatmul.mubr.msk.bf16.vlgmr.msra.gmra.mxu0 %vm280_vm0, %v735_v5  ;;  %679 = vmatmul.mubr.msk.bf16.vlgmr.msra.gmra.mxu1 %vm280_vm0, %v736_v6 }
  0x21   : > { %674 = vmatprep.mubr.msk.bf16.mxu0 %vm280_vm0, %v737_v7  ;;  %682 = vmatprep.mubr.msk.bf16.mxu1 %vm280_vm0, %v738_v8 }
  0x28   : > { %675 = vmatmul.mubr.msk.bf16.gmra.mxu0 %vm280_vm0, %v739_v9  ;;  %683 = vmatmul.mubr.msk.bf16.gmra.mxu1 %vm280_vm0, %v740_v10 }
  0xe0   : > { %v672_v12 = vpop.f32.mrf.mxu0  ;;  %v680_v13 = vpop.f32.mrf.mxu1 }
  0xe1   : > { %v929_v14 = vadd.f32 %v672_v12, %v926_v11  ;;  %v962_v41 = vadd.f32 %v680_v13, %v926_v11 }
  0xe2   : > { %v339_v15 = vpop.f32.mrf.mxu0  ;;  %v371_v16 = vpop.f32.mrf.mxu1 }
  0xe3   : > { %v639_v17 = vmul.f32 -1.442695, %v929_v14  ;;  %v933_v18 = vadd.f32 %v926_v11, %v339_v15  ;;  %v948_v31 = vadd.f32 %v926_v11, %v371_v16  ;;  %v647_v51 = vmul.f32 -1.442695, %v962_v41 }
  0xe4   : > { %v673_v19 = vpop.f32.mrf.mxu0  ;;  %v681_v20 = vpop.f32.mrf.mxu1 }
  0xe5   : > { %v637_v21 = vmul.f32 -1.442695, %v933_v18  ;;  %v937_v22 = vadd.f32 %v673_v19, %v926_v11  ;;  %741 = vpow2.f32 %v639_v17  ;;  %v645_v42 = vmul.f32 -1.442695, %v948_v31 }
  0xe6   : > { %v342_v23 = vpop.f32.mrf.mxu0  ;;  %v374_v24 = vpop.f32.mrf.mxu1  ;;  %v966_v44 = vadd.f32 %v681_v20, %v926_v11 }
  0xe7   : > { %743 = vpow2.f32 %v637_v21  ;;  %v640_v25 = vmul.f32 -1.442695, %v937_v22  ;;  %v941_v26 = vadd.f32 %v926_v11, %v342_v23  ;;  %v955_v37 = vadd.f32 %v926_v11, %v374_v24 }
  0xe8   : > { %v676_v27 = vpop.f32.mrf.mxu0  ;;  %v684_v28 = vpop.f32.mrf.mxu1  ;;  %v648_v53 = vmul.f32 -1.442695, %v966_v44 }
  0xe9   : > { %745 = vpow2.f32 %v640_v25  ;;  %v638_v29 = vmul.f32 -1.442695, %v941_v26  ;;  %v945_v30 = vadd.f32 %v676_v27, %v926_v11  ;;  %v646_v48 = vmul.f32 -1.442695, %v955_v37 }
  0xea   : > { %v355_v32 = vpop.f32.mrf.mxu0  ;;  %v387_v33 = vpop.f32.mrf.mxu1  ;;  %v984_v60 = vadd.f32 %v684_v28, %v926_v11 }
  0xeb   : > { %747 = vpow2.f32 %v638_v29  ;;  %v643_v34 = vmul.f32 -1.442695, %v945_v30  ;;  %v952_v35 = vadd.f32 %v926_v11, %v355_v32  ;;  %v973_v47 = vadd.f32 %v926_v11, %v387_v33 }
  0xec   : > { %v677_v36 = vpop.f32.mrf.mxu0  ;;  %v685_v40 = vpop.f32.mrf.mxu1  ;;  %v651_v2 = vmul.f32 -1.442695, %v984_v60 }
  0xed   : > { %v641_v38 = vmul.f32 -1.442695, %v952_v35  ;;  %v959_v39 = vadd.f32 %v677_v36, %v926_v11  ;;  %749 = vpow2.f32 %v643_v34  ;;  %v649_v55 = vmul.f32 -1.442695, %v973_v47 }
  0xee   : > { %v358_v43 = vpop.f32.mrf.mxu0  ;;  %v390_v50 = vpop.f32.mrf.mxu1  ;;  %v988_v1 = vadd.f32 %v685_v40, %v926_v11 }
  0xef   : > { %751 = vpow2.f32 %v641_v38  ;;  %v644_v45 = vmul.f32 -1.442695, %v959_v39  ;;  %v970_v46 = vadd.f32 %v926_v11, %v358_v43  ;;  %v981_v56 = vadd.f32 %v926_v11, %v390_v50 }
  0xf0   : > { %v652_v6 = vmul.f32 -1.442695, %v988_v1 }
  0xf1   : > { %753 = vpow2.f32 %v644_v45  ;;  %v642_v49 = vmul.f32 -1.442695, %v970_v46  ;;  %v650_v62 = vmul.f32 -1.442695, %v981_v56 }
  0xf2   : > { %755 = vpow2.f32 %v645_v42  ;;  %v742_v52 = vpop.eup %741 }
  0xf3   : > { %757 = vpow2.f32 %v642_v49  ;;  %v452_v59 = vadd.f32 1.0, %v742_v52 }
  0xf4   : > { %v744_v54 = vpop.eup %743  ;;  %759 = vpow2.f32 %v646_v48 }
  0xf5   : > { %v450_v57 = vadd.f32 1.0, %v744_v54  ;;  %761 = vpow2.f32 %v647_v51 }
  0xf6   : > { %v746_v58 = vpop.eup %745  ;;  %763 = vpow2.f32 %v648_v53 }
  0xf7   : > { %765 = vpow2.f32 %v649_v55  ;;  %v453_v63 = vadd.f32 1.0, %v746_v58 }
  0xf8   : > { %v748_v61 = vpop.eup %747  ;;  %767 = vrcp.f32 %v450_v57 }
  0xf9   : > { %v451_v0 = vadd.f32 1.0, %v748_v61  ;;  %769 = vrcp.f32 %v452_v59 }
  0xfa   : > { %v750_v3 = vpop.eup %749 }
  0xfb   : > { %771 = vrcp.f32 %v451_v0  ;;  %v456_v8 = vadd.f32 1.0, %v750_v3 }
  0xfc   : > { %v752_v4 = vpop.eup %751  ;;  %773 = vpow2.f32 %v650_v62 }
  0xfd   : > { %775 = vrcp.f32 %v453_v63  ;;  %v454_v5 = vadd.f32 1.0, %v752_v4 }
  0xfe   : > { %v754_v7 = vpop.eup %753  ;;  %777 = vpow2.f32 %v651_v2 }
  0xff   : > { %v756_v9 = vpop.eup %755  ;;  %779 = vrcp.f32 %v454_v5  ;;  %v457_v12 = vadd.f32 1.0, %v754_v7 }
 0x100   : > { %v758_v10 = vpop.eup %757  ;;  %781 = vpow2.f32 %v652_v6  ;;  %v458_v16 = vadd.f32 1.0, %v756_v9 }
 0x101   : > { %v455_v11 = vadd.f32 1.0, %v758_v10  ;;  %v760_v13 = vpop.eup %759  ;;  %783 = vrcp.f32 %v456_v8 }
 0x102   : > { %v762_v15 = vpop.eup %761  ;;  %v459_v20 = vadd.f32 1.0, %v760_v13 }
 0x103   : > { %785 = vrcp.f32 %v455_v11  ;;  %v764_v17 = vpop.eup %763  ;;  %v460_v24 = vadd.f32 1.0, %v762_v15 }
 0x104   : > { %v766_v19 = vpop.eup %765  ;;  %787 = vrcp.f32 %v457_v12  ;;  %v461_v29 = vadd.f32 1.0, %v764_v17 }
 0x105   : > { %v768_v21 = vpop.eup %767  ;;  %789 = vrcp.f32 %v458_v16  ;;  %v462_v40 = vadd.f32 1.0, %v766_v19 }
 0x106   : > { %v770_v23 = vpop.eup %769  ;;  %v498_v28 = vmul.f32 %v768_v21, %v933_v18  ;;  %791 = vrcp.f32 %v459_v20  ;;  %v514_v21 = vld [vmem:[%s902_s23] sm:$0x1] }
 0x107   : > { %v500_v36 = vmul.f32 %v770_v23, %v929_v14  ;;  %793 = vrcp.f32 %v460_v24 }
 0x108   : > { %v772_v25 = vpop.eup %771  ;;  %795 = vrcp.f32 %v461_v29 }
 0x109   : > { %v774_v27 = vpop.eup %773  ;;  %v499_v32 = vmul.f32 %v772_v25, %v941_v26  ;;  %797 = vrcp.f32 %v462_v40 }
 0x10a   : > { %v776_v33 = vpop.eup %775  ;;  %v463_v48 = vadd.f32 1.0, %v774_v27 }
 0x10b   : > { %v778_v34 = vpop.eup %777  ;;  %v515_v38 = vadd.f32 %v499_v32, %v498_v28  ;;  %v501_v43 = vmul.f32 %v776_v33, %v937_v22 }
 0x10c   : > { %v780_v42 = vpop.eup %779  ;;  %v464_v18 = vadd.f32 1.0, %v778_v34  ;;  %799 = vrcp.f32 %v463_v48 }
 0x10d   : > { %v516_v45 = vadd.f32 %v515_v38, %v500_v36  ;;  %v782_v49 = vpop.eup %781  ;;  %v502_v51 = vmul.f32 %v780_v42, %v952_v35 }
 0x10e   : > { %v784_v50 = vpop.eup %783  ;;  %v465_v54 = vadd.f32 1.0, %v782_v49  ;;  %801 = vrcp.f32 %v464_v18 }
 0x10f   : > { %v517_v26 = vadd.f32 %v516_v45, %v501_v43  ;;  %v504_v57 = vmul.f32 %v784_v50, %v945_v30 }
 0x110   : > { %v786_v52 = vpop.eup %785  ;;  %803 = vrcp.f32 %v465_v54 }
 0x111   : > { %v518_v53 = vadd.f32 %v517_v26, %v502_v51  ;;  %v503_v14 = vmul.f32 %v786_v52, %v970_v46  ;;  %v788_v55 = vpop.eup %787 }
 0x112   : > { %v790_v58 = vpop.eup %789  ;;  %v505_v59 = vmul.f32 %v788_v55, %v959_v39 }
 0x113   : > { %v519_v22 = vadd.f32 %v518_v53, %v503_v14  ;;  %v792_v62 = vpop.eup %791  ;;  %v506_v35 = vmul.f32 %v790_v58, %v948_v31 }
 0x114   : > { %v794_v0 = vpop.eup %793  ;;  %v507_v2 = vmul.f32 %v792_v62, %v955_v37 }
 0x115   : > { %v520_v61 = vadd.f32 %v519_v22, %v504_v57  ;;  %v796_v46 = vpop.eup %795  ;;  %v508_v4 = vmul.f32 %v794_v0, %v962_v41 }
 0x116   : > { %v798_v30 = vpop.eup %797  ;;  %v509_v6 = vmul.f32 %v796_v46, %v966_v44 }
 0x117   : > { %v521_v63 = vadd.f32 %v520_v61, %v505_v59  ;;  %v510_v39 = vmul.f32 %v798_v30, %v973_v47 }
 0x119   : > { %v522_v3 = vadd.f32 %v521_v63, %v506_v35  ;;  %v800_v8 = vpop.eup %799 }
 0x11a   : > { %v511_v31 = vmul.f32 %v800_v8, %v981_v56 }
 0x11b   : > { %v523_v5 = vadd.f32 %v522_v3, %v507_v2  ;;  %v802_v10 = vpop.eup %801 }
 0x11c   : > { %v512_v11 = vmul.f32 %v802_v10, %v984_v60 }
 0x11d   : > { %v524_v7 = vadd.f32 %v523_v5, %v508_v4  ;;  %v804_v37 = vpop.eup %803 }
 0x11e   : > { %v513_v41 = vmul.f32 %v804_v37, %v988_v1 }
 0x11f   : > { %v525_v9 = vadd.f32 %v524_v7, %v509_v6 }
 0x121   : > { %v526_v12 = vadd.f32 %v525_v9, %v510_v39 }
 0x123   : > { %v527_v13 = vadd.f32 %v526_v12, %v511_v31 }
 0x125   : > { %v528_v15 = vadd.f32 %v527_v13, %v512_v11 }
 0x127   : > { %v529_v16 = vadd.f32 %v528_v15, %v513_v41 }
 0x129   : > { %v530_v44 = vrot.slane %v529_v16, 4 }
 0x12b   : > { %v531_v17 = vadd.f32 %v530_v44, %v529_v16 }
 0x12d   : > { %v532_v19 = vrot.slane %v531_v17, 2 }
 0x12f   : > { %v533_v20 = vadd.f32 %v532_v19, %v531_v17 }
 0x131   : > { %v534_v47 = vrot.slane %v533_v20, 1 }
 0x133   : > { %v535_v23 = vadd.f32 %v534_v47, %v533_v20  ;;  %541 = sbr.rel (%p653_p8) target bundleno = 322 (0x142), region = 40 }
 0x135   : > { %v536_v24 = vadd.f32 %v535_v23, %v514_v21 }
 0x137   : > { %537 = vst [vmem:[%s902_s23] sm:$0x1] %v536_v24 }
 0x13e   : > { %v542_v56 = vld [vmem:[%s902_s23] sm:$0x1] }
 0x13f   : > { %v543_v60 = vmul.f32 0.00390625, %v542_v56 }
 0x141   : > { %544 = vst [vmem:[%s902_s23] sm:$0x1] %v543_v60 }
 0x142 PF: > { %s13_s16 = sadd.s32 1, %s843_s16   ;;  %s1032_s12 = smov %s835_s14 }
 0x143   : > { %p10_p9 = scmp.ge.s32.totalorder %s13_s16, 6   ;;  %s1033_s13 = smov %s839_s15 }
 0x144   : > { %s1034_s14 = smov %s1037_s17  ;;  %s1035_s15 = smov %s1041_s18 }
 0x145   :  { %12 = sbr.rel (!%p10_p9) target bundleno = 3 (0x3), region = 70 }

</bundles_post_ra>
